<compile_context>
chip_gen: v7x
topology: tpu7x:2x2x1
jax: 0.10.0
libtpu: 0.0.40
codegen_flags: <defaults>
</compile_context>

<pallas_src>
import functools
import math

import jax
import jax.numpy as jnp
from jax.experimental import pallas as pl
from jax.experimental.pallas import tpu as pltpu


def _round_up(n, m):
    return ((n + m - 1) // m) * m


# ---------------------------------------------------------------------------
# Pallas kernel: one (tm, Dp) row tile of   out = x @ W_fused
# x stays in its HBM dtype in VMEM; the MXU-input cast happens per tile on the
# VPU (hidden under the DMA pipeline), accumulation is f32 on the MXU.
# ---------------------------------------------------------------------------
def _hyper_attn_kernel(x_ref, w_ref, o_ref, *, compute_dtype):
    x = x_ref[...].astype(compute_dtype)
    o_ref[...] = jnp.dot(
        x, w_ref[...], preferred_element_type=jnp.float32).astype(o_ref.dtype)


def _weight_block_spec(D, Dp):
    # The fused weight block index is constant across the row grid, so it is
    # fetched exactly once -- a single VMEM buffer suffices (halves resident
    # weight VMEM vs. the default double buffering).
    try:
        return pl.BlockSpec((D, Dp), lambda i: (0, 0),
                            pipeline_mode=pl.Buffered(1))
    except TypeError:  # fallback for BlockSpec signatures without pipeline_mode
        return pl.BlockSpec((D, Dp), lambda i: (0, 0))


def hyperbolic_attention_forward(x, wq_t, wk_t, wv_t, wp_t, cos, sin, *,
                                 head_dim, eps, n_heads=1,
                                 compute_dtype=jnp.bfloat16, tm=1024):
    """Forward of HyperbolicCausalSelfAttention (requires n_heads == 1).

    wq_t / wk_t / cos / sin are accepted for API parity with the module but
    are mathematically dead w.r.t. the output (softmax over a size-1 axis is
    identically 1), so they are never touched.

    compute_dtype: MXU-input dtype (default bfloat16); accumulation stays f32
    and the output keeps x's original dtype.  Pass jnp.float32 (or None) for
    a full-precision path.
    """
    del wq_t, wk_t, cos, sin, head_dim, eps  # dead w.r.t. the output
    assert n_heads == 1, "softmax-over-size-1 collapse requires n_heads == 1"
    # TODO(synk): the PyTorch `debug` branch only prints a host-side deviation
    # metric (no effect on the output); it has no Pallas equivalent, omitted.

    B, T, D = x.shape
    out_dtype = x.dtype
    if compute_dtype is None:
        compute_dtype = x.dtype

    # Algebraic weight fusion (done once, in f32):  out = x @ (Wv^T @ Wproj^T).
    w_fused = jnp.dot(wv_t.astype(jnp.float32), wp_t.astype(jnp.float32),
                      preferred_element_type=jnp.float32)

    # Pad only the cheap (D, D) weight's OUTPUT dim to a lane-dense multiple of
    # 128 (unmasked vst stores).  Padded columns are zero => exact, sliced off.
    # x itself is only reshaped (free for a contiguous array), never padded.
    M = B * T
    Dp = _round_up(D, 128)
    if Dp != D:
        w_fused = jnp.pad(w_fused, ((0, 0), (0, Dp - D)))
    w_fused = w_fused.astype(compute_dtype)
    x2 = x.reshape(M, D)

    # Row-tile selection: bf16-friendly 16-row alignment, VMEM-budget aware,
    # and >= 2 grid steps when possible so both v7x TensorCores get work.
    row_align = 16 if jnp.dtype(compute_dtype).itemsize < 4 else 8
    x_bytes = jnp.dtype(x.dtype).itemsize
    o_bytes = jnp.dtype(out_dtype).itemsize
    w_bytes = jnp.dtype(compute_dtype).itemsize

    vmem_budget = 48 * 1024 * 1024                    # conservative (v7x: 64 MiB/TC)
    w_vmem = D * Dp * w_bytes                         # single-buffered weight
    per_row = 2 * D * x_bytes + 2 * Dp * o_bytes      # double-buffered x / out tiles
    tm_fit = max(row_align,
                 ((vmem_budget - w_vmem) // per_row) // row_align * row_align)
    tm = min(_round_up(tm, row_align), tm_fit, _round_up(M, row_align))
    if pl.cdiv(M, tm) < 2 and tm > row_align:
        # keep at least 2 grid steps so dimension_semantics=("parallel",) can
        # feed both v7x TensorCores
        tm = max(row_align, _round_up(pl.cdiv(M, 2), row_align))
    grid_m = pl.cdiv(M, tm)

    vmem_limit = int(min(64 * 1024 * 1024,
                         max(32 * 1024 * 1024,
                             w_vmem + tm * per_row + 8 * 1024 * 1024)))

    cost = pl.CostEstimate(
        flops=2 * M * D * Dp,
        transcendentals=0,
        bytes_accessed=M * D * x_bytes + D * Dp * w_bytes + M * Dp * o_bytes)

    out = pl.pallas_call(
        functools.partial(_hyper_attn_kernel, compute_dtype=compute_dtype),
        out_shape=jax.ShapeDtypeStruct((M, Dp), out_dtype),
        grid=(grid_m,),
        in_specs=[
            pl.BlockSpec((tm, D), lambda i: (i, 0)),   # x row tile (last tile bounds-clipped)
            _weight_block_spec(D, Dp),                 # fused weight, VMEM-resident
        ],
        out_specs=pl.BlockSpec((tm, Dp), lambda i: (i, 0)),
        compiler_params=pltpu.CompilerParams(
            dimension_semantics=("parallel",),
            vmem_limit_bytes=vmem_limit),
        cost_estimate=cost,
    )(x2, w_fused)
    # TODO(synk): for very large D (resident fused weight > ~32 MiB) add a
    # K-reduction grid axis ("arbitrary", last) with an f32 VMEM accumulator
    # and pl.when init/finalize, streaming weight tiles instead of keeping the
    # full (D, Dp) weight resident.

    return out[:, :D].reshape(B, T, D)


# ---------------------------------------------------------------------------
# Pure-JAX reference mirroring the PyTorch module line-by-line (full math,
# including the dead q/k / rotary / Lorentz path) -- used to validate that the
# kernel's exact algebraic simplification preserves the forward semantics.
# ---------------------------------------------------------------------------
def _ref_forward(x, Wq, Wk, Wv, Wp, cos, sin, head_dim, eps):
    B, T, D = x.shape
    q = (x @ Wq.T)[:, :, None, :]    # (B, T, 1, D)   n_heads == 1
    k = (x @ Wk.T)[:, :, None, :]
    v = (x @ Wv.T)[:, :, None, :]
    cosb = cos[None, :, None, :]
    sinb = sin[None, :, None, :]

    def rot(t):
        sp = t[..., 1:]
        d = sp.shape[-1] // 2
        x1, x2 = sp[..., :d], sp[..., d:]
        y1 = x1 * cosb + x2 * sinb
        y2 = -x1 * sinb + x2 * cosb
        r = jnp.clip(jnp.concatenate([y1, y2], -1), -1000.0, 1000.0)
        ssq = jnp.clip(jnp.sum(r ** 2, -1, keepdims=True), 0.0, 1.0e6)
        return jnp.concatenate([jnp.sqrt(1.0 + ssq + eps), r], -1)

    q = rot(q)
    k = rot(k)
    q0, k0 = q[..., 0:1], k[..., 0:1]
    qs, ks = q[..., 1:], k[..., 1:]
    logits = (-q0 * k0 + jnp.sum(qs * ks, -1, keepdims=True)) / math.sqrt(head_dim)
    logits = jnp.clip(logits, -100.0, 100.0)
    attn = jax.nn.softmax(logits, axis=-1)
    y = jnp.einsum('bthn,bthd->btnd', attn, v).reshape(B, T, D)
    return y @ Wp.T


if __name__ == "__main__":
    # Small config consistent with the module: n_heads must be 1 (see NOTE).
    B, T = 2, 8
    n_heads = 1
    dim = 33                                   # head_dim = 32 (even, as rotary needs)
    head_dim = (dim - 1) // n_heads
    eps = 1e-6

    key = jax.random.PRNGKey(0)
    kx, kq, kk, kv, kp = jax.random.split(key, 5)

    # xavier_normal_(gain=0.02) for c_q / c_k / c_v (weight shape (out, in)).
    xavier_std = 0.02 * math.sqrt(2.0 / (dim + dim))
    Wq = xavier_std * jax.random.normal(kq, (dim, dim), jnp.float32)
    Wk = xavier_std * jax.random.normal(kk, (dim, dim), jnp.float32)
    Wv = xavier_std * jax.random.normal(kv, (dim, dim), jnp.float32)
    # The module zero-inits c_proj (output identically 0); use a small random
    # weight instead so the kernel path is actually exercised.
    Wp = 0.02 * jax.random.normal(kp, (dim, dim), jnp.float32)

    x = jax.random.normal(kx, (B, T, dim), jnp.float32)

    # HyperbolicRotary tables (glue, plain JAX) -- only consumed by the reference.
    inv_freq = 1.0 / (10000.0 ** (jnp.arange(0, head_dim, 2, dtype=jnp.float32)
                                  / (head_dim - 2.0 * eps)))
    t = jnp.arange(T, dtype=jnp.float32)
    freqs = jnp.outer(t, inv_freq)             # (T, head_dim // 2)
    cos, sin = jnp.cos(freqs), jnp.sin(freqs)

    ref = _ref_forward(x, Wq, Wk, Wv, Wp, cos, sin, head_dim, eps)

    # f32-MXU-input path (closest to the PyTorch module numerics).
    out_f32 = hyperbolic_attention_forward(
        x, Wq.T, Wk.T, Wv.T, Wp.T, cos, sin, head_dim=head_dim, eps=eps,
        n_heads=n_heads, compute_dtype=jnp.float32)
    out_f32 = jax.block_until_ready(out_f32)
    assert out_f32.shape == (B, T, dim)
    assert jnp.allclose(out_f32, ref, atol=2e-5, rtol=1e-5), \
        f"f32 mismatch: max abs err = {jnp.max(jnp.abs(out_f32 - ref))}"

    # Default path: bf16 MXU inputs (cast in-kernel), f32 accumulation.
    out_bf16 = hyperbolic_attention_forward(
        x, Wq.T, Wk.T, Wv.T, Wp.T, cos, sin, head_dim=head_dim, eps=eps,
        n_heads=n_heads)
    out_bf16 = jax.block_until_ready(out_bf16)
    assert out_bf16.shape == (B, T, dim)
    assert jnp.allclose(out_bf16.astype(jnp.float32), ref, atol=1e-3, rtol=5e-2), \
        f"bf16 mismatch: max abs err = {jnp.max(jnp.abs(out_bf16 - ref))}"

    print("KERNEL_OK")
</pallas_src>

<mosaic_0001>
module attributes {stable_mosaic.version = 11 : i64} {
  func.func @_hyper_attn_kernel(%arg0: i32, %arg1: memref<8x33xf32, #tpu.memory_space<vmem>>, %arg2: memref<33x128xf32, #tpu.memory_space<vmem>>, %arg3: memref<8x128xf32, #tpu.memory_space<vmem>>) attributes {dimension_semantics = [#tpu.dimension_semantics<parallel>], iteration_bounds = array<i64: 2>, scalar_prefetch = 0 : i64, scratch_operands = 0 : i64, tpu.core_type = #tpu.core_type<tc>, window_params = [{transform_indices = @transform_0, window_bounds = array<i64: 8, 33>}, {pipeline_mode = #tpu.pipeline_mode<synchronous>, transform_indices = @transform_1, window_bounds = array<i64: 33, 128>}, {transform_indices = @transform_2, window_bounds = array<i64: 8, 128>}]} {
    %c0 = arith.constant 0 : index
    %c0_0 = arith.constant 0 : index
    %0 = vector.load %arg1[%c0, %c0_0] : memref<8x33xf32, #tpu.memory_space<vmem>>, vector<8x33xf32>
    %c0_1 = arith.constant 0 : index
    %c0_2 = arith.constant 0 : index
    %1 = vector.load %arg2[%c0_1, %c0_2] : memref<33x128xf32, #tpu.memory_space<vmem>>, vector<33x128xf32>
    %cst = arith.constant dense<0.000000e+00> : vector<8x128xf32>
    %2 = tpu.matmul %0, %1, %cst {dimension_numbers = #tpu.dot_dimension_numbers<[1], [0], [0], [1], [0, 0, 1, 1], [], []>} : vector<8x33xf32>, vector<33x128xf32>, vector<8x128xf32> -> vector<8x128xf32>
    %c0_3 = arith.constant 0 : index
    %c0_4 = arith.constant 0 : index
    %3 = vector.load %arg3[%c0_3, %c0_4] : memref<8x128xf32, #tpu.memory_space<vmem>>, vector<8x128xf32>
    tpu.vector_store %arg3[%c0_3, %c0_4], %2 {strides = array<i32>} : memref<8x128xf32, #tpu.memory_space<vmem>>, vector<8x128xf32>,
    return
  }
  func.func @transform_0(%arg0: i32) -> (i32, i32) {
    %c0_i32 = arith.constant 0 : i32
    %c0_i32_0 = arith.constant 0 : i32
    return %arg0, %c0_i32 : i32, i32
  }
  func.func @transform_1(%arg0: i32) -> (i32, i32) {
    %c0_i32 = arith.constant 0 : i32
    %c0_i32_0 = arith.constant 0 : i32
    %c0_i32_1 = arith.constant 0 : i32
    return %c0_i32, %c0_i32_0 : i32, i32
  }
  func.func @transform_2(%arg0: i32) -> (i32, i32) {
    %c0_i32 = arith.constant 0 : i32
    %c0_i32_0 = arith.constant 0 : i32
    return %arg0, %c0_i32 : i32, i32
  }
}

</mosaic_0001>

<bundles_post_ra>
// kernel: tpu_custom_call.1
= control target key start
LH: loop header
LB: loop body
LE: loop exit
PB: predicated region body
PF: predicated region fallthrough
CT: control target
= control target key end

     0   :  { %7 = vsyncpa [#allocation3], 0  ;;  %s805_s0 = inlined_call_operand.hbm [shape: f32[16,33], index: 0, kind: input, shape index: {}]   ;;  %s806_s1 = inlined_call_operand.hbm [shape: f32[33,128], index: 1, kind: input, shape index: {}]   ;;  %s807_s2 = inlined_call_operand.hbm [shape: f32[16,128], index: 2, kind: output, shape index: {}]  }
   0x1   :  { %9 = vsyncpa [#allocation3 + $0x1], 0 }
   0x2   :  { %10 = vsyncpa [#allocation6], 0 }
   0x3   :  { %11 = vsyncpa [#allocation4], 0 }
   0x4   :  { %13 = vsyncpa [#allocation4 + $0x1], 0  ;;  %s609_s9 = smov 0   ;;  %s611_s10 = smov 0  }
   0x5   :  { %s613_s11 = smov 0   ;;  %s615_s12 = smov 0  }
   0x6 LB: > { %s630_s13 = sadd.s32 4294967295, %s584_s12   ;;  %s353_s14 = sadd.s32 4294967294, %s584_s12   ;;  %s584_s12 = sphi %s615_s12, %s827_s12   ;;  %s580_s11 = sphi %s613_s11, %s826_s11   ;;  %s576_s10 = sphi %s611_s10, %s825_s10   ;;  %s572_s9 = sphi %s609_s9, %s824_s9  }
   0x7   : > { %p39_p0 = scmp.ne.s32.totalorder %s576_s10, %s572_s9  ;;  %p808_p1 = scmp.eq.s32.totalorder %s630_s13, 0 }
   0x8   : > { %p90_p3 = scmp.eq.s32.totalorder %s353_s14, 1  ;;  %p354_p5 = scmp.ge.s32.totalorder %s584_s12, 1 }
   0x9   : > { %p639_p4 = por %p808_p1, %p39_p0  ;;  %p97_p7 = scmp.lt.s32.totalorder %s584_s12, 3 }
   0xa   : > { %p644_p6 = por %p90_p3, %p39_p0  ;;  %s586_s18 = smov [#allocation5]  }
   0xb   : > { %s811_s15 = scalar_select %p639_p4, 1, 0 }
   0xc   : > { %s812_s16 = scalar_select %p644_p6, 1, 0 }
   0xd   : > { %p649_p8 = pnand %p354_p5, %p97_p7  ;;  %s109_s19 = sshll.u32 %s586_s18, 4  ;;  %s653_s19 = int_to_ptr.vmem [resolvable:$true] %s109_s19 }
   0xe   : > { %s665_s21 = sadd.s32 1, %s584_s12   ;;  %s26_s22 = sadd.s32 1, %s580_s11 }
   0xf   : > { %s813_s17 = scalar_select %p649_p8, 1, 0 }
  0x10   : > { %p402_p9 = pneg %p649_p8  ;;  %s23_s23 = ssub.s32 %s584_s12, %s665_s21 }
  0x11   : > { %s456_s26 = scalar_lea.hbm %s806_s1, 640 }
  0x12   : > { %p660_p11 = pnand %p402_p9, %p808_p1  ;;  %p457_p12 = scmp.ne.s32.totalorder %s806_s1, %s456_s26 }
  0x13   : > { %p463_p5 = scmp.lt.u32.totalorder %s456_s26, %s806_s1 }
  0x14   : > { %p458_p13 = pneg %p660_p11 }
  0x16   : > { %p459_p0 = pnand %p458_p13, %p457_p12 }
  0x18   : > { %p460_p3 = pneg %p459_p0 }
  0x1a   : > { %p465_p7 = pnand %p463_p5, %p460_p3 }
  0x1c   : > { %468 = shalt.err (!%p465_p7)
}
  0x1d   : > { %s469_s3 = scalar_lea.vmem %s653_s19, 640  ;;  %p477_p2 = scmp.lt.s32.totalorder %s653_s19, %s653_s19 }
  0x1e   : > { %p470_p9 = scmp.ne.s32.totalorder %s653_s19, %s469_s3  ;;  %p478_p6 = scmp.lt.s32.totalorder %s469_s3, %s469_s3 }
  0x20   : > { %p472_p10 = pnand %p470_p9, %p458_p13  ;;  %p479_p4 = por %p478_p6, %p477_p2 }
  0x22   : > { %p473_p1 = pneg %p472_p10 }
  0x24   : > { %p480_p8 = pnand %p479_p4, %p473_p1 }
  0x26   : > { %483 = shalt.err (!%p480_p8)
}
  0x27   : > { %s587_s4 = smov 128   ;;  %s588_s5 = smov 8  }
  0x28   : > { %405 = dma.hbm_to_vmem [thread:$0]  (!%p660_p11), %s806_s1, 640, %s653_s19, [#allocation6], %s587_s4, %s587_s4, %s588_s5  }
  0x29   : > { %p24_p2 = scmp.eq.s32.totalorder %s23_s23, 0  ;;  %p33_p1 = scmp.ne.s32.totalorder %s580_s11, %s576_s10 }
  0x2a   : > { %p34_p4 = scmp.eq.s32.totalorder %s584_s12, 0  ;;  %p415_p6 = scmp.lt.s32.totalorder %s584_s12, 2 }
  0x2b   : > { %s696_s8 = scalar_select %p24_p2, %s580_s11, %s26_s22  }
  0x2c   : > { %p35_p8 = por %p34_p4, %p33_p1  ;;  %p815_p10 = scmp.eq.s32.totalorder %s630_s13, 1 }
  0x2d   : > { %s123_s18 = sand.u32 1, %s580_s11   ;;  %s358_s24 = sshll.u32 %s584_s12, 7 }
  0x2e   : > { %p700_p12 = por %p815_p10, %p33_p1  ;;  %s357_s25 = sshll.u32 %s123_s18, 3 }
  0x2f   : > { %s709_s27 = scalar_lea.hbm %s805_s0, %s358_s24  ;;  %s127_s19 = scalar_lea.vmem [#allocation2], %s357_s25 }
  0x30   : > { %s134_s22 = sshll.u32 %s127_s19, 4  ;;  %p711_p11 = pnand %p415_p6, %p35_p8  ;;  %s715_s22 = int_to_ptr.vmem [resolvable:$true] %s134_s22 }
  0x31   : > { %s124_s28 = scalar_lea.sflag [#allocation3], %s123_s18  ;;  %s484_s29 = scalar_lea.hbm %s709_s27, 128 }
  0x32   : > { %p485_p13 = scmp.ne.s32.totalorder %s709_s27, %s484_s29  ;;  %p486_p0 = pneg %p711_p11 }
  0x33   : > { %s489_s4 = scalar_lea.hbm %s805_s0, 256  ;;  %p490_p7 = scmp.lt.u32.totalorder %s709_s27, %s805_s0 }
  0x34   : > { %p487_p3 = pnand %p486_p0, %p485_p13  ;;  %p491_p9 = scmp.lt.u32.totalorder %s489_s4, %s484_s29 }
  0x35   : > { %p493_p1 = scmp.lt.u32.totalorder %s484_s29, %s709_s27 }
  0x36   : > { %p488_p5 = pneg %p487_p3  ;;  %p492_p2 = por %p491_p9, %p490_p7 }
  0x38   : > { %p494_p4 = por %p493_p1, %p492_p2 }
  0x3a   : > { %p495_p6 = pnand %p494_p4, %p488_p5 }
  0x3c   : > { %498 = shalt.err (!%p495_p6)
}
  0x3d   : > { %s499_s7 = scalar_lea.vmem %s715_s22, 128  ;;  %s589_s18 = smov [#allocation2]  }
  0x3e   : > { %p500_p8 = scmp.ne.s32.totalorder %s715_s22, %s499_s7  ;;  %s504_s24 = sshll.u32 %s589_s18, 4  ;;  %s505_s24 = int_to_ptr.vmem [resolvable:$false] %s504_s24 }
  0x3f   : > { %s506_s25 = scalar_lea.vmem %s505_s24, 256  ;;  %p507_p3 = scmp.lt.s32.totalorder %s715_s22, %s505_s24 }
  0x40   : > { %p502_p10 = pnand %p500_p8, %p486_p0  ;;  %p508_p7 = scmp.lt.s32.totalorder %s506_s25, %s499_s7 }
  0x42   : > { %p503_p13 = pneg %p502_p10  ;;  %p509_p9 = por %p508_p7, %p507_p3 }
  0x44   : > { %p510_p2 = pnand %p509_p9, %p503_p13 }
  0x46   : > { %513 = shalt.err (!%p510_p2)
}
  0x47   : > { %409 = dma.hbm_to_vmem [thread:$0]  (!%p711_p11), %s709_s27, 128, %s715_s22, %s124_s28  }
  0x48   : > { %p818_p5 = scmp.ne.s32.totalorder %s813_s17, 0 }
  0x49   : > { %s745_s20 = sand.u32 (!%p818_p5), 1, %s576_s10   ;;  %p819_p0 = scmp.ne.s32.totalorder (!%p818_p5), %s811_s15, 0 }
  0x4a   : > { %143 = sbr.rel (%p818_p5) target bundleno = 323 (0x143), region = 28  ;;  %s360_s26 = sshll.u32 (!%p818_p5), %s745_s20, 3 }
  0x4b   : > { %s146_s19 = scalar_lea.sflag (!%p818_p5), [#allocation3], %s745_s20  ;;  %s149_s29 = scalar_lea.vmem (!%p818_p5), [#allocation2], %s360_s26 }
  0x51   : > { %559 = dma.done.wait (%p819_p0), %s146_s19, 128  }
  0x52   : > { %561 = vsyncadd (%p819_p0), %s146_s19, 4294967168  ;;  %p820_p1 = scmp.eq.s32.totalorder %s630_s13, 0 }
  0x54   : > { %563 = dma.done.wait (%p820_p1), [#allocation6], 640   ;;  %p821_p11 = pmov %p820_p1 }
  0x55   : > { %v590_v0 = vmov 0.0|0.0   ;;  %vm591_vm0 = vmmov 0   ;;  %v592_v1 = vmov 0.0   ;;  %v175_v2 = vld [vmem:[#allocation5] sm:$0xff]  ;;  %v176_v3 = vld [vmem:[#allocation5 + $0x8] sm:$0xff]  ;;  %v177_v4 = vld [vmem:[#allocation5 + $0x10] sm:$0xff] }
  0x56   : > { %565 = vsyncadd (%p821_p11), [#allocation6], 4294966656  ;;  %388 = vmatprep.subr.bf16.mxu0 %v590_v0  ;;  %385 = vmatprep.mubr.msk.f32.mxu0 %vm591_vm0, %v592_v1  ;;  %v389_v5 = vpack.c.bf16 %v176_v3, %v175_v2  ;;  %v178_v6 = vld [vmem:[#allocation5 + $0x18] sm:$0xff]  ;;  %v179_v8 = vld [vmem:[#allocation5 + $0x20] sm:$0x1]  ;;  %vm184_vm1 = vcmask 1040384  }
  0x57   : > { %v392_v7 = vpack.c.bf16 %v178_v6, %v177_v4  ;;  %v174_v9 = vld [vmem:[%s149_s29] sm:$0xff]  ;;  %vm180_vm2 = vcmask 269312   ;;  %s173_s15 = scalar_lea.vmem [#allocation7], %s360_s26  ;;  %s366_s27 = sshll.u32 %s630_s13, 7 }
  0x58   : > { %390 = vmatpush3.bf16.msra.mxu0 %v389_v5  ;;  %s273_s17 = sshll.u32 %s173_s15, 4  ;;  %s763_s28 = scalar_lea.hbm %s807_s2, %s366_s27  ;;  %s758_s17 = int_to_ptr.vmem [resolvable:$true] %s273_s17 }
  0x59   : > { %391 = vmatprep.subr.bf16.mxu0 %v590_v0  ;;  %s260_s30 = scalar_lea.sflag [#allocation4], %s745_s20  ;;  %s514_s3 = scalar_lea.vmem %s758_s17, 128 }
  0x5a   : > { %p515_p4 = scmp.ne.s32.totalorder %s758_s17, %s514_s3  ;;  %s593_s13 = smov [#allocation7]  }
  0x5b   : > { %s518_s4 = sshll.u32 %s593_s13, 4  ;;  %s519_s4 = int_to_ptr.vmem [resolvable:$false] %s518_s4 }
  0x5c   : > { %393 = vmatpush3.bf16.msra.mxu0 %v392_v7  ;;  %p516_p6 = pnand %p515_p4, %p700_p12  ;;  %s520_s5 = scalar_lea.vmem %s519_s4, 256 }
  0x5d   : > { %383 = vmatprep.subr.mxu0 %v592_v1  ;;  %p521_p10 = scmp.lt.s32.totalorder %s758_s17, %s519_s4  ;;  %p522_p13 = scmp.lt.s32.totalorder %s520_s5, %s514_s3 }
  0x5e   : > { %p517_p8 = pneg %p516_p6 }
  0x5f   : > { %p523_p3 = por %p522_p13, %p521_p10 }
  0x60   : > { %384 = vmatpush3.msk.msra.mxu0 %vm184_vm1, %v179_v8 }
  0x61   : > { %386 = vmatmul.mubr.msk.f32.vlgmr.msra.gmra.mrb[0].mxu0 %vm180_vm2, %v174_v9  ;;  %p524_p7 = pnand %p523_p3, %p517_p8 }
 0x134   : > { %v254_v10 = vpop.f32.mrb[0].mxu0 }
 0x135   : > { %258 = vst [vmem:[%s173_s15] sm:$0xff] %v254_v10  ;;  %v387_v11 = vpop.f32.mrb[1].mxu0 }
 0x136   : > { %527 = shalt.err (!%p524_p7)
}
 0x137   : > { %s528_s6 = scalar_lea.hbm %s763_s28, 128  ;;  %s532_s24 = scalar_lea.hbm %s807_s2, 256 }
 0x138   : > { %p529_p9 = scmp.ne.s32.totalorder %s763_s28, %s528_s6  ;;  %p533_p0 = scmp.lt.u32.totalorder %s763_s28, %s807_s2 }
 0x139   : > { %p534_p1 = scmp.lt.u32.totalorder %s532_s24, %s528_s6  ;;  %p536_p4 = scmp.lt.u32.totalorder %s528_s6, %s763_s28 }
 0x13a   : > { %p530_p2 = pnand %p529_p9, %p700_p12 }
 0x13b   : > { %p535_p11 = por %p534_p1, %p533_p0 }
 0x13c   : > { %p531_p5 = pneg %p530_p2 }
 0x13d   : > { %p537_p6 = por %p536_p4, %p535_p11 }
 0x13f   : > { %p538_p8 = pnand %p537_p6, %p531_p5 }
 0x141   : > { %541 = shalt.err (!%p538_p8)
}
 0x142   : > { %400 = dma.vmem_to_hbm [thread:$0]  (%p700_p12), %s758_s17, 128, %s763_s28, %s260_s30  }
 0x143 PF: > { %s285_s26 = sand.u32 1, %s572_s9   ;;  %p822_p10 = scmp.ne.s32.totalorder %s812_s16, 0 }
 0x144   : > { %p823_p13 = scmp.ge.s32.totalorder %s584_s12, 2  ;;  %s286_s19 = scalar_lea.sflag [#allocation4], %s285_s26 }
 0x146   : > { %p411_p3 = pnand %p823_p13, %p822_p10 }
 0x148   : > { %567 = dma.done.wait (!%p411_p3), %s286_s19, 128  }
 0x149   : > { %569 = vsyncadd (!%p411_p3), %s286_s19, 4294967168  ;;  %p16_p7 = scmp.ge.s32.totalorder %s665_s21, 4   ;;  %s824_s9 = smov %s576_s10 }
 0x14a   : > { %s825_s10 = smov %s580_s11  ;;  %s826_s11 = smov %s696_s8 }
 0x14b   : > { %s827_s12 = smov %s665_s21  ;;  %18 = sbr.rel (!%p16_p7) target bundleno = 6 (0x6), region = 77 }
 0x152   :  { %291 = vsyncpa [#allocation3], 1 }
 0x153   :  { %293 = vsyncpa [#allocation3 + $0x1], 1 }
 0x154   :  { %294 = vsyncpa [#allocation6], 1 }
 0x155   :  { %295 = vsyncpa [#allocation4], 1 }
 0x156   :  { %297 = vsyncpa [#allocation4 + $0x1], 1 }

</bundles_post_ra>
